<compile_context>
chip_gen: v7x
topology: tpu7x:2x2x1
jax: 0.10.0
libtpu: 0.0.40
codegen_flags: <defaults>
</compile_context>

<pallas_src>
import jax
import jax.numpy as jnp
from jax.experimental import pallas as pl

D_MODEL = 32
NUM_HEADS = 4
D_FF = 64
HEAD_DIM = D_MODEL // NUM_HEADS
EPS = 1e-5  # nn.LayerNorm default


def _layer_norm(x, gamma, beta):
    # x: (N, D), gamma/beta: (1, D).  PyTorch LayerNorm uses biased variance.
    mean = jnp.mean(x, axis=-1, keepdims=True)
    var = jnp.mean((x - mean) ** 2, axis=-1, keepdims=True)
    return (x - mean) * jax.lax.rsqrt(var + EPS) * gamma + beta


def encoder_layer(x, params):
    """x: (B, S, D) float32; params: 16 arrays (see make_params)."""
    B, S, D = x.shape
    assert D == D_MODEL
    (wq, bq, wk, bk, wv, bv, wo, bo,
     g1, be1, g2, be2, w1, bf1, w2, bf2) = params

    # ---- host-side packing: fewer, larger pallas inputs (17 -> 8) ----
    w_qkv = jnp.concatenate([wq, wk, wv], axis=1)              # (D, 3D)
    b_qkv = jnp.concatenate([bq, bk, bv], axis=1)              # (1, 3D)
    vec_pack = jnp.concatenate([bo, g1, be1, g2, be2, bf2], 0)  # (6, D)
    x_flat = x.reshape(B * S, D)                               # free XLA reshape

    scale = 1.0 / float(HEAD_DIM) ** 0.5

    def kernel(x_ref, wqkv_ref, bqkv_ref, wo_ref, w1_ref, w2_ref,
               vec_ref, bf1_ref, out_ref):
        xv = x_ref[...]                                        # (B*S, D) f32

        # -- fused QKV projection: one MXU push for all tokens and q/k/v --
        qkv = (jnp.dot(xv, wqkv_ref[...], preferred_element_type=jnp.float32)
               + bqkv_ref[...])                                # (B*S, 3D)
        q = qkv[:, 0:D] * scale                                # scale folded in
        k = qkv[:, D:2 * D]
        v = qkv[:, 2 * D:3 * D]

        # -- self-attention: batched over B with leading-batch einsums --
        head_ctx = []
        for h in range(NUM_HEADS):                             # tiny static loop
            sl = slice(h * HEAD_DIM, (h + 1) * HEAD_DIM)
            qh = q[:, sl].reshape(B, S, HEAD_DIM)              # (B, S, hd)
            kh = k[:, sl].reshape(B, S, HEAD_DIM)
            vh = v[:, sl].reshape(B, S, HEAD_DIM)
            s = jnp.einsum('bqd,bkd->bqk', qh, kh,
                           preferred_element_type=jnp.float32)  # (B, S, S)
            s = s - jnp.max(s, axis=-1, keepdims=True)
            p = jnp.exp(s)
            p = p * pl.reciprocal(jnp.sum(p, axis=-1, keepdims=True),
                                  approx=True)
            c = jnp.einsum('bqk,bkd->bqd', p, vh,
                           preferred_element_type=jnp.float32)  # (B, S, hd)
            head_ctx.append(c.reshape(B * S, HEAD_DIM))
        ctx = jnp.concatenate(head_ctx, axis=-1)               # (B*S, D)

        vec = vec_ref[...]                                     # (6, D)
        bo_v, g1_v, be1_v = vec[0:1, :], vec[1:2, :], vec[2:3, :]
        g2_v, be2_v, bf2_v = vec[3:4, :], vec[4:5, :], vec[5:6, :]

        attn = (jnp.dot(ctx, wo_ref[...], preferred_element_type=jnp.float32)
                + bo_v)

        # -- residual + norm1 (dropout = identity in eval mode) --
        h1 = _layer_norm(xv + attn, g1_v, be1_v)

        # -- FFN: Linear(D, d_ff) -> ReLU -> Linear(d_ff, D) --
        ff = (jnp.dot(h1, w1_ref[...], preferred_element_type=jnp.float32)
              + bf1_ref[...])
        ff = jnp.maximum(ff, 0.0)
        ff = (jnp.dot(ff, w2_ref[...], preferred_element_type=jnp.float32)
              + bf2_v)

        # -- residual + norm2 (dropout = identity in eval mode) --
        out_ref[...] = _layer_norm(h1 + ff, g2_v, be2_v).astype(out_ref.dtype)

    out_flat = pl.pallas_call(
        kernel,
        out_shape=jax.ShapeDtypeStruct((B * S, D), x.dtype),
        # Gridless call: every input/output is a whole-array VMEM block.
    )(x_flat, w_qkv, b_qkv, wo, w1, w2, vec_pack, bf1)
    return out_flat.reshape(B, S, D)


def make_params(key):
    """Deterministic synthetic parameters (shapes from EncoderLayer.__init__)."""
    keys = jax.random.split(key, 12)
    s = 0.1
    wq = jax.random.normal(keys[0], (D_MODEL, D_MODEL), jnp.float32) * s
    bq = jax.random.normal(keys[1], (1, D_MODEL), jnp.float32) * s
    wk = jax.random.normal(keys[2], (D_MODEL, D_MODEL), jnp.float32) * s
    bk = jax.random.normal(keys[3], (1, D_MODEL), jnp.float32) * s
    wv = jax.random.normal(keys[4], (D_MODEL, D_MODEL), jnp.float32) * s
    bv = jax.random.normal(keys[5], (1, D_MODEL), jnp.float32) * s
    wo = jax.random.normal(keys[6], (D_MODEL, D_MODEL), jnp.float32) * s
    bo = jax.random.normal(keys[7], (1, D_MODEL), jnp.float32) * s
    # LayerNorm affine params (PyTorch default init: gamma=1, beta=0)
    g1 = jnp.ones((1, D_MODEL), jnp.float32)
    be1 = jnp.zeros((1, D_MODEL), jnp.float32)
    g2 = jnp.ones((1, D_MODEL), jnp.float32)
    be2 = jnp.zeros((1, D_MODEL), jnp.float32)
    # FFN
    w1 = jax.random.normal(keys[8], (D_MODEL, D_FF), jnp.float32) * s
    bf1 = jax.random.normal(keys[9], (1, D_FF), jnp.float32) * s
    w2 = jax.random.normal(keys[10], (D_FF, D_MODEL), jnp.float32) * s
    bf2 = jax.random.normal(keys[11], (1, D_MODEL), jnp.float32) * s
    return [wq, bq, wk, bk, wv, bv, wo, bo,
            g1, be1, g2, be2, w1, bf1, w2, bf2]


def reference(x, params):
    """Pure-JAX reference matching the PyTorch module (eval mode)."""
    (wq, bq, wk, bk, wv, bv, wo, bo,
     g1, be1, g2, be2, w1, bf1, w2, bf2) = params
    B, S, D = x.shape
    q = (x @ wq + bq).reshape(B, S, NUM_HEADS, HEAD_DIM)
    k = (x @ wk + bk).reshape(B, S, NUM_HEADS, HEAD_DIM)
    v = (x @ wv + bv).reshape(B, S, NUM_HEADS, HEAD_DIM)
    s = jnp.einsum('bqhd,bkhd->bhqk', q, k) / jnp.sqrt(jnp.float32(HEAD_DIM))
    p = jax.nn.softmax(s, axis=-1)
    ctx = jnp.einsum('bhqk,bkhd->bqhd', p, v).reshape(B, S, D)
    attn = ctx @ wo + bo

    def ln(y, g, b):
        m = y.mean(-1, keepdims=True)
        var = ((y - m) ** 2).mean(-1, keepdims=True)
        return (y - m) * jax.lax.rsqrt(var + EPS) * g + b

    h1 = ln(x + attn, g1, be1)
    ff = jnp.maximum(h1 @ w1 + bf1, 0.0) @ w2 + bf2
    return ln(h1 + ff, g2, be2)


if __name__ == "__main__":
    B, S = 2, 8
    root = jax.random.PRNGKey(0)
    kx, kp = jax.random.split(root)
    x = jax.random.normal(kx, (B, S, D_MODEL), jnp.float32)
    params = make_params(kp)

    out = encoder_layer(x, params)
    jax.block_until_ready(out)
    assert out.shape == (B, S, D_MODEL)
    assert jnp.all(jnp.isfinite(out))

    ref = reference(x, params)
    # approx reciprocal in the softmax => loose-but-meaningful tolerance
    assert bool(jnp.allclose(out, ref, atol=3e-2, rtol=3e-2))
    print("KERNEL_OK")
</pallas_src>

<mosaic_0001>
module attributes {stable_mosaic.version = 11 : i64} {
  func.func @kernel(%arg0: memref<16x32xf32, #tpu.memory_space<vmem>>, %arg1: memref<32x96xf32, #tpu.memory_space<vmem>>, %arg2: memref<1x96xf32, #tpu.memory_space<vmem>>, %arg3: memref<32x32xf32, #tpu.memory_space<vmem>>, %arg4: memref<32x64xf32, #tpu.memory_space<vmem>>, %arg5: memref<64x32xf32, #tpu.memory_space<vmem>>, %arg6: memref<6x32xf32, #tpu.memory_space<vmem>>, %arg7: memref<1x64xf32, #tpu.memory_space<vmem>>, %arg8: memref<16x32xf32, #tpu.memory_space<vmem>>) attributes {dimension_semantics = [], scalar_prefetch = 0 : i64, scratch_operands = 0 : i64, tpu.core_type = #tpu.core_type<tc>} {
    %c0 = arith.constant 0 : index
    %c0_0 = arith.constant 0 : index
    %0 = vector.load %arg0[%c0, %c0_0] : memref<16x32xf32, #tpu.memory_space<vmem>>, vector<16x32xf32>
    %c0_1 = arith.constant 0 : index
    %c0_2 = arith.constant 0 : index
    %1 = vector.load %arg1[%c0_1, %c0_2] : memref<32x96xf32, #tpu.memory_space<vmem>>, vector<32x96xf32>
    %cst = arith.constant dense<0.000000e+00> : vector<16x96xf32>
    %2 = tpu.matmul %0, %1, %cst {dimension_numbers = #tpu.dot_dimension_numbers<[1], [0], [0], [1], [0, 0, 1, 1], [], []>} : vector<16x32xf32>, vector<32x96xf32>, vector<16x96xf32> -> vector<16x96xf32>
    %c0_3 = arith.constant 0 : index
    %c0_4 = arith.constant 0 : index
    %3 = vector.load %arg2[%c0_3, %c0_4] : memref<1x96xf32, #tpu.memory_space<vmem>>, vector<1x96xf32>
    %4 = vector.broadcast %3 : vector<1x96xf32> to vector<16x96xf32>
    %5 = arith.addf %2, %4 : vector<16x96xf32>
    %6 = vector.extract_strided_slice %5 {offsets = [0, 0], sizes = [16, 32], strides = [1, 1]} : vector<16x96xf32> to vector<16x32xf32>
    %cst_5 = arith.constant 0.353553385 : f32
    %7 = vector.broadcast %cst_5 : f32 to vector<16x32xf32>
    %8 = arith.mulf %6, %7 : vector<16x32xf32>
    %9 = vector.extract_strided_slice %5 {offsets = [0, 32], sizes = [16, 32], strides = [1, 1]} : vector<16x96xf32> to vector<16x32xf32>
    %10 = vector.extract_strided_slice %5 {offsets = [0, 64], sizes = [16, 32], strides = [1, 1]} : vector<16x96xf32> to vector<16x32xf32>
    %11 = vector.extract_strided_slice %8 {offsets = [0, 0], sizes = [16, 8], strides = [1, 1]} : vector<16x32xf32> to vector<16x8xf32>
    %12 = vector.shape_cast %11 : vector<16x8xf32> to vector<2x8x8xf32>
    %13 = vector.extract_strided_slice %9 {offsets = [0, 0], sizes = [16, 8], strides = [1, 1]} : vector<16x32xf32> to vector<16x8xf32>
    %14 = vector.shape_cast %13 : vector<16x8xf32> to vector<2x8x8xf32>
    %15 = vector.extract_strided_slice %10 {offsets = [0, 0], sizes = [16, 8], strides = [1, 1]} : vector<16x32xf32> to vector<16x8xf32>
    %16 = vector.shape_cast %15 : vector<16x8xf32> to vector<2x8x8xf32>
    "tpu.trace_start"() <{level = 10 : i32, message = "bqd,bkd->bqk"}> : () -> ()
    %cst_6 = arith.constant dense<0.000000e+00> : vector<2x8x8xf32>
    %17 = tpu.matmul %12, %14, %cst_6 {dimension_numbers = #tpu.dot_dimension_numbers<[2], [2], [1], [1], [0, 0, 0, 1, 1, 1], [0], [0]>} : vector<2x8x8xf32>, vector<2x8x8xf32>, vector<2x8x8xf32> -> vector<2x8x8xf32>
    "tpu.trace_stop"() : () -> ()
    %cst_7 = arith.constant dense<0xFF800000> : vector<2x8xf32>
    %18 = vector.multi_reduction <maximumf>, %17, %cst_7 [2] : vector<2x8x8xf32> to vector<2x8xf32>
    %19 = vector.shape_cast %18 : vector<2x8xf32> to vector<2x8x1xf32>
    %20 = vector.broadcast %19 : vector<2x8x1xf32> to vector<2x8x8xf32>
    %21 = arith.subf %17, %20 : vector<2x8x8xf32>
    %22 = math.exp %21 : vector<2x8x8xf32>
    %cst_8 = arith.constant dense<0.000000e+00> : vector<2x8xf32>
    %23 = vector.multi_reduction <add>, %22, %cst_8 [2] : vector<2x8x8xf32> to vector<2x8xf32>
    %24 = vector.shape_cast %23 : vector<2x8xf32> to vector<2x8x1xf32>
    %25 = tpu.reciprocal %24 {approx = true} : vector<2x8x1xf32> -> vector<2x8x1xf32>
    %26 = vector.broadcast %25 : vector<2x8x1xf32> to vector<2x8x8xf32>
    %27 = arith.mulf %22, %26 : vector<2x8x8xf32>
    "tpu.trace_start"() <{level = 10 : i32, message = "bqk,bkd->bqd"}> : () -> ()
    %cst_9 = arith.constant dense<0.000000e+00> : vector<2x8x8xf32>
    %28 = tpu.matmul %27, %16, %cst_9 {dimension_numbers = #tpu.dot_dimension_numbers<[2], [1], [1], [2], [0, 0, 0, 1, 1, 2], [0], [0]>} : vector<2x8x8xf32>, vector<2x8x8xf32>, vector<2x8x8xf32> -> vector<2x8x8xf32>
    "tpu.trace_stop"() : () -> ()
    %29 = vector.shape_cast %28 : vector<2x8x8xf32> to vector<16x8xf32>
    %30 = vector.extract_strided_slice %8 {offsets = [0, 8], sizes = [16, 8], strides = [1, 1]} : vector<16x32xf32> to vector<16x8xf32>
    %31 = vector.shape_cast %30 : vector<16x8xf32> to vector<2x8x8xf32>
    %32 = vector.extract_strided_slice %9 {offsets = [0, 8], sizes = [16, 8], strides = [1, 1]} : vector<16x32xf32> to vector<16x8xf32>
    %33 = vector.shape_cast %32 : vector<16x8xf32> to vector<2x8x8xf32>
    %34 = vector.extract_strided_slice %10 {offsets = [0, 8], sizes = [16, 8], strides = [1, 1]} : vector<16x32xf32> to vector<16x8xf32>
    %35 = vector.shape_cast %34 : vector<16x8xf32> to vector<2x8x8xf32>
    "tpu.trace_start"() <{level = 10 : i32, message = "bqd,bkd->bqk"}> : () -> ()
    %cst_10 = arith.constant dense<0.000000e+00> : vector<2x8x8xf32>
    %36 = tpu.matmul %31, %33, %cst_10 {dimension_numbers = #tpu.dot_dimension_numbers<[2], [2], [1], [1], [0, 0, 0, 1, 1, 1], [0], [0]>} : vector<2x8x8xf32>, vector<2x8x8xf32>, vector<2x8x8xf32> -> vector<2x8x8xf32>
    "tpu.trace_stop"() : () -> ()
    %cst_11 = arith.constant dense<0xFF800000> : vector<2x8xf32>
    %37 = vector.multi_reduction <maximumf>, %36, %cst_11 [2] : vector<2x8x8xf32> to vector<2x8xf32>
    %38 = vector.shape_cast %37 : vector<2x8xf32> to vector<2x8x1xf32>
    %39 = vector.broadcast %38 : vector<2x8x1xf32> to vector<2x8x8xf32>
    %40 = arith.subf %36, %39 : vector<2x8x8xf32>
    %41 = math.exp %40 : vector<2x8x8xf32>
    %cst_12 = arith.constant dense<0.000000e+00> : vector<2x8xf32>
    %42 = vector.multi_reduction <add>, %41, %cst_12 [2] : vector<2x8x8xf32> to vector<2x8xf32>
    %43 = vector.shape_cast %42 : vector<2x8xf32> to vector<2x8x1xf32>
    %44 = tpu.reciprocal %43 {approx = true} : vector<2x8x1xf32> -> vector<2x8x1xf32>
    %45 = vector.broadcast %44 : vector<2x8x1xf32> to vector<2x8x8xf32>
    %46 = arith.mulf %41, %45 : vector<2x8x8xf32>
    "tpu.trace_start"() <{level = 10 : i32, message = "bqk,bkd->bqd"}> : () -> ()
    %cst_13 = arith.constant dense<0.000000e+00> : vector<2x8x8xf32>
    %47 = tpu.matmul %46, %35, %cst_13 {dimension_numbers = #tpu.dot_dimension_numbers<[2], [1], [1], [2], [0, 0, 0, 1, 1, 2], [0], [0]>} : vector<2x8x8xf32>, vector<2x8x8xf32>, vector<2x8x8xf32> -> vector<2x8x8xf32>
    "tpu.trace_stop"() : () -> ()
    %48 = vector.shape_cast %47 : vector<2x8x8xf32> to vector<16x8xf32>
    %49 = vector.extract_strided_slice %8 {offsets = [0, 16], sizes = [16, 8], strides = [1, 1]} : vector<16x32xf32> to vector<16x8xf32>
    %50 = vector.shape_cast %49 : vector<16x8xf32> to vector<2x8x8xf32>
    %51 = vector.extract_strided_slice %9 {offsets = [0, 16], sizes = [16, 8], strides = [1, 1]} : vector<16x32xf32> to vector<16x8xf32>
    %52 = vector.shape_cast %51 : vector<16x8xf32> to vector<2x8x8xf32>
    %53 = vector.extract_strided_slice %10 {offsets = [0, 16], sizes = [16, 8], strides = [1, 1]} : vector<16x32xf32> to vector<16x8xf32>
    %54 = vector.shape_cast %53 : vector<16x8xf32> to vector<2x8x8xf32>
    "tpu.trace_start"() <{level = 10 : i32, message = "bqd,bkd->bqk"}> : () -> ()
    %cst_14 = arith.constant dense<0.000000e+00> : vector<2x8x8xf32>
    %55 = tpu.matmul %50, %52, %cst_14 {dimension_numbers = #tpu.dot_dimension_numbers<[2], [2], [1], [1], [0, 0, 0, 1, 1, 1], [0], [0]>} : vector<2x8x8xf32>, vector<2x8x8xf32>, vector<2x8x8xf32> -> vector<2x8x8xf32>
    "tpu.trace_stop"() : () -> ()
    %cst_15 = arith.constant dense<0xFF800000> : vector<2x8xf32>
    %56 = vector.multi_reduction <maximumf>, %55, %cst_15 [2] : vector<2x8x8xf32> to vector<2x8xf32>
    %57 = vector.shape_cast %56 : vector<2x8xf32> to vector<2x8x1xf32>
    %58 = vector.broadcast %57 : vector<2x8x1xf32> to vector<2x8x8xf32>
    %59 = arith.subf %55, %58 : vector<2x8x8xf32>
    %60 = math.exp %59 : vector<2x8x8xf32>
    %cst_16 = arith.constant dense<0.000000e+00> : vector<2x8xf32>
    %61 = vector.multi_reduction <add>, %60, %cst_16 [2] : vector<2x8x8xf32> to vector<2x8xf32>
    %62 = vector.shape_cast %61 : vector<2x8xf32> to vector<2x8x1xf32>
    %63 = tpu.reciprocal %62 {approx = true} : vector<2x8x1xf32> -> vector<2x8x1xf32>
    %64 = vector.broadcast %63 : vector<2x8x1xf32> to vector<2x8x8xf32>
    %65 = arith.mulf %60, %64 : vector<2x8x8xf32>
    "tpu.trace_start"() <{level = 10 : i32, message = "bqk,bkd->bqd"}> : () -> ()
    %cst_17 = arith.constant dense<0.000000e+00> : vector<2x8x8xf32>
    %66 = tpu.matmul %65, %54, %cst_17 {dimension_numbers = #tpu.dot_dimension_numbers<[2], [1], [1], [2], [0, 0, 0, 1, 1, 2], [0], [0]>} : vector<2x8x8xf32>, vector<2x8x8xf32>, vector<2x8x8xf32> -> vector<2x8x8xf32>
    "tpu.trace_stop"() : () -> ()
    %67 = vector.shape_cast %66 : vector<2x8x8xf32> to vector<16x8xf32>
    %68 = vector.extract_strided_slice %8 {offsets = [0, 24], sizes = [16, 8], strides = [1, 1]} : vector<16x32xf32> to vector<16x8xf32>
    %69 = vector.shape_cast %68 : vector<16x8xf32> to vector<2x8x8xf32>
    %70 = vector.extract_strided_slice %9 {offsets = [0, 24], sizes = [16, 8], strides = [1, 1]} : vector<16x32xf32> to vector<16x8xf32>
    %71 = vector.shape_cast %70 : vector<16x8xf32> to vector<2x8x8xf32>
    %72 = vector.extract_strided_slice %10 {offsets = [0, 24], sizes = [16, 8], strides = [1, 1]} : vector<16x32xf32> to vector<16x8xf32>
    %73 = vector.shape_cast %72 : vector<16x8xf32> to vector<2x8x8xf32>
    "tpu.trace_start"() <{level = 10 : i32, message = "bqd,bkd->bqk"}> : () -> ()
    %cst_18 = arith.constant dense<0.000000e+00> : vector<2x8x8xf32>
    %74 = tpu.matmul %69, %71, %cst_18 {dimension_numbers = #tpu.dot_dimension_numbers<[2], [2], [1], [1], [0, 0, 0, 1, 1, 1], [0], [0]>} : vector<2x8x8xf32>, vector<2x8x8xf32>, vector<2x8x8xf32> -> vector<2x8x8xf32>
    "tpu.trace_stop"() : () -> ()
    %cst_19 = arith.constant dense<0xFF800000> : vector<2x8xf32>
    %75 = vector.multi_reduction <maximumf>, %74, %cst_19 [2] : vector<2x8x8xf32> to vector<2x8xf32>
    %76 = vector.shape_cast %75 : vector<2x8xf32> to vector<2x8x1xf32>
    %77 = vector.broadcast %76 : vector<2x8x1xf32> to vector<2x8x8xf32>
    %78 = arith.subf %74, %77 : vector<2x8x8xf32>
    %79 = math.exp %78 : vector<2x8x8xf32>
    %cst_20 = arith.constant dense<0.000000e+00> : vector<2x8xf32>
    %80 = vector.multi_reduction <add>, %79, %cst_20 [2] : vector<2x8x8xf32> to vector<2x8xf32>
    %81 = vector.shape_cast %80 : vector<2x8xf32> to vector<2x8x1xf32>
    %82 = tpu.reciprocal %81 {approx = true} : vector<2x8x1xf32> -> vector<2x8x1xf32>
    %83 = vector.broadcast %82 : vector<2x8x1xf32> to vector<2x8x8xf32>
    %84 = arith.mulf %79, %83 : vector<2x8x8xf32>
    "tpu.trace_start"() <{level = 10 : i32, message = "bqk,bkd->bqd"}> : () -> ()
    %cst_21 = arith.constant dense<0.000000e+00> : vector<2x8x8xf32>
    %85 = tpu.matmul %84, %73, %cst_21 {dimension_numbers = #tpu.dot_dimension_numbers<[2], [1], [1], [2], [0, 0, 0, 1, 1, 2], [0], [0]>} : vector<2x8x8xf32>, vector<2x8x8xf32>, vector<2x8x8xf32> -> vector<2x8x8xf32>
    "tpu.trace_stop"() : () -> ()
    %86 = vector.shape_cast %85 : vector<2x8x8xf32> to vector<16x8xf32>
    %87 = tpu.concatenate %29, %48, %67, %86 in 1 : vector<16x8xf32>, vector<16x8xf32>, vector<16x8xf32>, vector<16x8xf32> -> vector<16x32xf32>
    %c0_22 = arith.constant 0 : index
    %c0_23 = arith.constant 0 : index
    %88 = vector.load %arg6[%c0_22, %c0_23] : memref<6x32xf32, #tpu.memory_space<vmem>>, vector<6x32xf32>
    %89 = vector.extract_strided_slice %88 {offsets = [0, 0], sizes = [1, 32], strides = [1, 1]} : vector<6x32xf32> to vector<1x32xf32>
    %90 = vector.extract_strided_slice %88 {offsets = [1, 0], sizes = [1, 32], strides = [1, 1]} : vector<6x32xf32> to vector<1x32xf32>
    %91 = vector.extract_strided_slice %88 {offsets = [2, 0], sizes = [1, 32], strides = [1, 1]} : vector<6x32xf32> to vector<1x32xf32>
    %92 = vector.extract_strided_slice %88 {offsets = [3, 0], sizes = [1, 32], strides = [1, 1]} : vector<6x32xf32> to vector<1x32xf32>
    %93 = vector.extract_strided_slice %88 {offsets = [4, 0], sizes = [1, 32], strides = [1, 1]} : vector<6x32xf32> to vector<1x32xf32>
    %94 = vector.extract_strided_slice %88 {offsets = [5, 0], sizes = [1, 32], strides = [1, 1]} : vector<6x32xf32> to vector<1x32xf32>
    %c0_24 = arith.constant 0 : index
    %c0_25 = arith.constant 0 : index
    %95 = vector.load %arg3[%c0_24, %c0_25] : memref<32x32xf32, #tpu.memory_space<vmem>>, vector<32x32xf32>
    %cst_26 = arith.constant dense<0.000000e+00> : vector<16x32xf32>
    %96 = tpu.matmul %87, %95, %cst_26 {dimension_numbers = #tpu.dot_dimension_numbers<[1], [0], [0], [1], [0, 0, 1, 1], [], []>} : vector<16x32xf32>, vector<32x32xf32>, vector<16x32xf32> -> vector<16x32xf32>
    %97 = vector.broadcast %89 : vector<1x32xf32> to vector<16x32xf32>
    %98 = arith.addf %96, %97 : vector<16x32xf32>
    %99 = arith.addf %0, %98 : vector<16x32xf32>
    %cst_27 = arith.constant dense<0.000000e+00> : vector<16xf32>
    %100 = vector.multi_reduction <add>, %99, %cst_27 [1] : vector<16x32xf32> to vector<16xf32>
    %101 = vector.shape_cast %100 : vector<16xf32> to vector<16x1xf32>
    %cst_28 = arith.constant 3.200000e+01 : f32
    %102 = vector.broadcast %cst_28 : f32 to vector<16x1xf32>
    %103 = arith.divf %101, %102 : vector<16x1xf32>
    %104 = vector.broadcast %103 : vector<16x1xf32> to vector<16x32xf32>
    %105 = arith.subf %99, %104 : vector<16x32xf32>
    %106 = arith.mulf %105, %105 : vector<16x32xf32>
    %cst_29 = arith.constant dense<0.000000e+00> : vector<16xf32>
    %107 = vector.multi_reduction <add>, %106, %cst_29 [1] : vector<16x32xf32> to vector<16xf32>
    %108 = vector.shape_cast %107 : vector<16xf32> to vector<16x1xf32>
    %cst_30 = arith.constant 3.200000e+01 : f32
    %109 = vector.broadcast %cst_30 : f32 to vector<16x1xf32>
    %110 = arith.divf %108, %109 : vector<16x1xf32>
    %111 = vector.broadcast %103 : vector<16x1xf32> to vector<16x32xf32>
    %112 = arith.subf %99, %111 : vector<16x32xf32>
    %cst_31 = arith.constant 9.99999974E-6 : f32
    %113 = vector.broadcast %cst_31 : f32 to vector<16x1xf32>
    %114 = arith.addf %110, %113 : vector<16x1xf32>
    %115 = math.rsqrt %114 : vector<16x1xf32>
    %116 = vector.broadcast %115 : vector<16x1xf32> to vector<16x32xf32>
    %117 = arith.mulf %112, %116 : vector<16x32xf32>
    %118 = vector.broadcast %90 : vector<1x32xf32> to vector<16x32xf32>
    %119 = arith.mulf %117, %118 : vector<16x32xf32>
    %120 = vector.broadcast %91 : vector<1x32xf32> to vector<16x32xf32>
    %121 = arith.addf %119, %120 : vector<16x32xf32>
    %c0_32 = arith.constant 0 : index
    %c0_33 = arith.constant 0 : index
    %122 = vector.load %arg4[%c0_32, %c0_33] : memref<32x64xf32, #tpu.memory_space<vmem>>, vector<32x64xf32>
    %cst_34 = arith.constant dense<0.000000e+00> : vector<16x64xf32>
    %123 = tpu.matmul %121, %122, %cst_34 {dimension_numbers = #tpu.dot_dimension_numbers<[1], [0], [0], [1], [0, 0, 1, 1], [], []>} : vector<16x32xf32>, vector<32x64xf32>, vector<16x64xf32> -> vector<16x64xf32>
    %c0_35 = arith.constant 0 : index
    %c0_36 = arith.constant 0 : index
    %124 = vector.load %arg7[%c0_35, %c0_36] : memref<1x64xf32, #tpu.memory_space<vmem>>, vector<1x64xf32>
    %125 = vector.broadcast %124 : vector<1x64xf32> to vector<16x64xf32>
    %126 = arith.addf %123, %125 : vector<16x64xf32>
    %cst_37 = arith.constant 0.000000e+00 : f32
    %127 = vector.broadcast %cst_37 : f32 to vector<16x64xf32>
    %128 = arith.maximumf %126, %127 : vector<16x64xf32>
    %c0_38 = arith.constant 0 : index
    %c0_39 = arith.constant 0 : index
    %129 = vector.load %arg5[%c0_38, %c0_39] : memref<64x32xf32, #tpu.memory_space<vmem>>, vector<64x32xf32>
    %cst_40 = arith.constant dense<0.000000e+00> : vector<16x32xf32>
    %130 = tpu.matmul %128, %129, %cst_40 {dimension_numbers = #tpu.dot_dimension_numbers<[1], [0], [0], [1], [0, 0, 1, 1], [], []>} : vector<16x64xf32>, vector<64x32xf32>, vector<16x32xf32> -> vector<16x32xf32>
    %131 = vector.broadcast %94 : vector<1x32xf32> to vector<16x32xf32>
    %132 = arith.addf %130, %131 : vector<16x32xf32>
    %133 = arith.addf %121, %132 : vector<16x32xf32>
    %cst_41 = arith.constant dense<0.000000e+00> : vector<16xf32>
    %134 = vector.multi_reduction <add>, %133, %cst_41 [1] : vector<16x32xf32> to vector<16xf32>
    %135 = vector.shape_cast %134 : vector<16xf32> to vector<16x1xf32>
    %cst_42 = arith.constant 3.200000e+01 : f32
    %136 = vector.broadcast %cst_42 : f32 to vector<16x1xf32>
    %137 = arith.divf %135, %136 : vector<16x1xf32>
    %138 = vector.broadcast %137 : vector<16x1xf32> to vector<16x32xf32>
    %139 = arith.subf %133, %138 : vector<16x32xf32>
    %140 = arith.mulf %139, %139 : vector<16x32xf32>
    %cst_43 = arith.constant dense<0.000000e+00> : vector<16xf32>
    %141 = vector.multi_reduction <add>, %140, %cst_43 [1] : vector<16x32xf32> to vector<16xf32>
    %142 = vector.shape_cast %141 : vector<16xf32> to vector<16x1xf32>
    %cst_44 = arith.constant 3.200000e+01 : f32
    %143 = vector.broadcast %cst_44 : f32 to vector<16x1xf32>
    %144 = arith.divf %142, %143 : vector<16x1xf32>
    %145 = vector.broadcast %137 : vector<16x1xf32> to vector<16x32xf32>
    %146 = arith.subf %133, %145 : vector<16x32xf32>
    %cst_45 = arith.constant 9.99999974E-6 : f32
    %147 = vector.broadcast %cst_45 : f32 to vector<16x1xf32>
    %148 = arith.addf %144, %147 : vector<16x1xf32>
    %149 = math.rsqrt %148 : vector<16x1xf32>
    %150 = vector.broadcast %149 : vector<16x1xf32> to vector<16x32xf32>
    %151 = arith.mulf %146, %150 : vector<16x32xf32>
    %152 = vector.broadcast %92 : vector<1x32xf32> to vector<16x32xf32>
    %153 = arith.mulf %151, %152 : vector<16x32xf32>
    %154 = vector.broadcast %93 : vector<1x32xf32> to vector<16x32xf32>
    %155 = arith.addf %153, %154 : vector<16x32xf32>
    %c0_46 = arith.constant 0 : index
    %c0_47 = arith.constant 0 : index
    %156 = vector.load %arg8[%c0_46, %c0_47] : memref<16x32xf32, #tpu.memory_space<vmem>>, vector<16x32xf32>
    tpu.vector_store %arg8[%c0_46, %c0_47], %155 {strides = array<i32>} : memref<16x32xf32, #tpu.memory_space<vmem>>, vector<16x32xf32>,
    return
  }
}

</mosaic_0001>

<bundles_post_ra>
// kernel: tpu_custom_call.1
= control target key start
LH: loop header
LB: loop body
LE: loop exit
PB: predicated region body
PF: predicated region fallthrough
CT: control target
= control target key end

     0   :  { %13 = vsyncpa [#allocation3], 0  ;;  %s2586_s0 = inlined_call_operand.hbm [shape: f32[16,32], index: 0, kind: input, shape index: {}]   ;;  %s2587_s1 = inlined_call_operand.vmem [shape: f32[32,96], index: 1, kind: input, shape index: {}]   ;;  %s2588_s2 = inlined_call_operand.vmem [shape: f32[1,96], index: 2, kind: input, shape index: {}]   ;;  %s2589_s3 = inlined_call_operand.vmem [shape: f32[32,32], index: 3, kind: input, shape index: {}]   ;;  %s2590_s4 = inlined_call_operand.vmem [shape: f32[32,64], index: 4, kind: input, shape index: {}]   ;;  %s2591_s5 = inlined_call_operand.vmem [shape: f32[64,32], index: 5, kind: input, shape index: {}]   ;;  %s2592_s6 = inlined_call_operand.vmem [shape: f32[6,32], index: 6, kind: input, shape index: {}]   ;;  %s2593_s7 = inlined_call_operand.vmem [shape: f32[1,64], index: 7, kind: input, shape index: {}]   ;;  %s2594_s8 = inlined_call_operand.hbm [shape: f32[16,32], index: 8, kind: output, shape index: {}]  }
   0x1   :  { %14 = vsyncpa [#allocation4], 0  ;;  %s2245_s27 = smov [#allocation2]   ;;  %s2197_s9 = scalar_lea.hbm %s2586_s0, 256 }
   0x2   :  { %s20_s28 = sshll.u32 %s2245_s27, 4  ;;  %p2198_p0 = scmp.ne.s32.totalorder %s2586_s0, %s2197_s9  ;;  %s21_s28 = int_to_ptr.vmem [resolvable:$true] %s20_s28 }
   0x3   :  { %p2201_p1 = scmp.lt.u32.totalorder %s2197_s9, %s2586_s0 }
   0x5   :  { %p2203_p2 = pnand %p2201_p1, %p2198_p0 }
   0x7   :  { %2206 = shalt.err (!%p2203_p2)
}
   0x8   :  { %s2207_s14 = scalar_lea.vmem %s21_s28, 256  ;;  %p2212_p4 = scmp.lt.s32.totalorder %s21_s28, %s21_s28 }
   0x9   :  { %p2208_p3 = scmp.ne.s32.totalorder %s21_s28, %s2207_s14  ;;  %p2213_p5 = scmp.lt.s32.totalorder %s2207_s14, %s2207_s14 }
   0xb   :  { %p2214_p6 = por %p2213_p5, %p2212_p4 }
   0xd   :  { %p2215_p7 = pnand %p2214_p6, %p2208_p3 }
   0xf   :  { %2218 = shalt.err (!%p2215_p7)
}
  0x10   :  { %s2246_s15 = smov 128   ;;  %s2247_s16 = smov 8  }
  0x11   :  { %26 = dma.hbm_to_vmem [thread:$0]  %s2586_s0, 256, %s21_s28, [#allocation3], %s2246_s15, %s2246_s15, %s2247_s16  }
  0x12   :  { %2241 = dma.done.wait [#allocation3], 256  }
  0x13   :  { %2242 = vsyncadd [#allocation3], 4294967040  ;;  %vm57_vm0 = vcmask 261120   ;;  %v46_v0 = vld [vmem:[%s2587_s1] sm:$0xff]  ;;  %v47_v1 = vld [vmem:[%s2587_s1 + $0x8] sm:$0xff]  ;;  %v2248_v8 = vmov 0.0  }
  0x14   :  { %v48_v2 = vld [vmem:[%s2587_s1 + $0x10] sm:$0xff]  ;;  %v2098_v3 = vpack.c.bf16 %v47_v1, %v46_v0  ;;  %v49_v4 = vld [vmem:[%s2587_s1 + $0x18] sm:$0xff]  ;;  %v2336_v5 = vld [vmem:[#allocation2] sm:$0xff]  ;;  %1987 = vmatprep.subr.mxu0 %v2248_v8  ;;  %vm2249_vm1 = vmmov 0   ;;  %s2250_s27 = smov 96   ;;  %vm144_vm2 = vcmask 64512  }
  0x15   :  { %v2102_v6 = vpack.c.bf16 %v49_v4, %v48_v2  ;;  %1974 = vmatprep.mubr.msk.f32.mxu1 %vm57_vm0, %v2336_v5  ;;  %v2340_v7 = vld [vmem:[#allocation2 + $0x8] sm:$0xff]  ;;  %1989 = vmatprep.mubr.msk.f32.mxu0 %vm2249_vm1, %v2248_v8  ;;  %v1872_v9 = vld [vmem:[%s2588_s2] ss:$0 sm:$0xff]  ;;  %s2251_s2 = smov 64   ;;  %s2252_s28 = smov 88   ;;  %vm1491_vm3 = vcmask 195584  }
  0x16   :  { %2099 = vmatprep.subr.bf16.mxu1 %v2098_v3  ;;  %s2253_s29 = smov 120   ;;  %s2254_s30 = smov 56   ;;  %vm1488_vm4 = vcmask 130048   ;;  %vm1731_vm5 = vcmask 523264  }
  0x17   :  { %2101 = vmatpush3.bf16.msra.mxu1 %v2098_v3  ;;  %s2255_s9 = smov 80   ;;  %s2256_s10 = smov 112  }
  0x18   :  { %2103 = vmatprep.subr.bf16.mxu1 %v2102_v6  ;;  %s2257_s11 = smov 48   ;;  %s2258_s12 = smov 72  }
  0x19   :  { %s2259_s13 = smov 104   ;;  %s2260_s14 = smov 40  }
  0x1a   :  { %s2261_s17 = smov 16   ;;  %s2262_s26 = smov 24  }
  0x1b   :  { %2105 = vmatpush3.bf16.msra.mxu1 %v2102_v6 }
  0x1c   :  { %1977 = vmatprep.subr.mxu1 %v2248_v8 }
  0x1e   :  { %1975 = vmatmul.mubr.msk.f32.vlgmr.msra.gmra.mrb[0].mxu1 %vm57_vm0, %v2340_v7 }
  0x1f   :  { %1979 = vmatprep.mubr.msk.f32.mxu1 %vm2249_vm1, %v2248_v8 }
  0xf1   :  { %v1976_v10 = vpop.f32.mrb[0].mxu1 }
  0xf2   :  { %v130_v11 = vpop.f32.mrb[1].mxu1  ;;  %v2356_v13 = vadd.f32 %v1976_v10, %v1872_v9 }
  0xf3   :  { %v2353_v12 = vadd.f32 %v1872_v9, %v130_v11 }
  0xf4   :  { %v2370_v17 = vmul.f32 0.35355338, %v2356_v13 }
  0xf5   :  { %142 = vrot.lane.b32.xlu0 %v2353_v12, %s2250_s27  ;;  %v2362_v15 = vmul.f32 0.35355338, %v2353_v12 }
  0xf9   :  { %221 = vrot.lane.b32.xlu0 %v2356_v13, %s2250_s27 }
 0x167   :  { %v143_v14 = vpop.permute.xlu0 %142 }
 0x168   :  { %1978 = vmatpush3.xpose.msk.msra.mxu1 %vm144_vm2, %v143_v14 }
 0x169   :  { %1982 = vmatprep.subr.mxu1 %v2248_v8 }
 0x16b   :  { %v222_v16 = vpop.permute.xlu0 %221  ;;  %1980 = vmatmul.mubr.msk.f32.vlgmr.msra.gmra.mrb[2].mxu1 %vm144_vm2, %v2362_v15 }
 0x16c   :  { %1983 = vmatpush3.xpose.msk.msra.mxu1 %vm144_vm2, %v222_v16  ;;  %1984 = vmatprep.mubr.msk.f32.mxu1 %vm2249_vm1, %v2248_v8 }
 0x16d   :  { %1992 = vmatprep.subr.mxu1 %v2248_v8 }
 0x16f   :  { %1985 = vmatmul.mubr.msk.f32.vlgmr.msra.gmra.mrb[4].mxu1 %vm144_vm2, %v2370_v17 }
 0x170   :  { %1994 = vmatprep.mubr.msk.f32.mxu1 %vm2249_vm1, %v2248_v8 }
 0x23e   :  { %v216_v18 = vpop.f32.mrb[2].mxu1 }
 0x23f   :  { %v1981_v19 = vpop.f32.mrb[3].mxu1  ;;  %v298_v20 = vsel %vm144_vm2, %v216_v18, -inf }
 0x240   :  { %299 = vmax.xlane.f32.xlu1 %v298_v20 }
 0x242   :  { %v294_v21 = vpop.f32.mrb[4].mxu1 }
 0x243   :  { %v1986_v22 = vpop.f32.mrb[5].mxu1  ;;  %v301_v23 = vsel %vm144_vm2, %v294_v21, -inf }
 0x244   :  { %302 = vmax.xlane.f32.xlu1 %v301_v23 }
 0x255   :  { %320 = vrot.lane.b32.xlu1 %v2353_v12, %s2251_s2 }
 0x259   :  { %396 = vrot.lane.b32.xlu1 %v2356_v13, %s2251_s2 }
 0x25d   :  { %474 = vrot.lane.b32.xlu1 %v2353_v12, %s2252_s28 }
 0x261   :  { %552 = vrot.lane.b32.xlu1 %v2356_v13, %s2252_s28 }
 0x2cd   :  { %v300_v24 = vpop.xlane.xlu1 %299 }
 0x2ce   :  { %v304_v25 = vsub.f32 %v216_v18, %v300_v24 }
 0x2d0   :  { %v306_v26 = vmul.f32 1.442695, %v304_v25 }
 0x2d1   :  { %v303_v27 = vpop.xlane.xlu1 %302 }
 0x2d2   :  { %2157 = vpow2.f32 %v306_v26  ;;  %v305_v28 = vsub.f32 %v294_v21, %v303_v27 }
 0x2d4   :  { %v308_v29 = vmul.f32 1.442695, %v305_v28 }
 0x2d5   :  { %v321_v30 = vpop.permute.xlu1 %320 }
 0x2d6   :  { %2159 = vpow2.f32 %v308_v29  ;;  %1988 = vmatpush3.msra.mxu0 %v321_v30 }
 0x2d7   :  { %1997 = vmatprep.subr.mxu0 %v2248_v8 }
 0x2d9   :  { %v397_v31 = vpop.permute.xlu1 %396 }
 0x2da   :  { %1993 = vmatpush3.msra.mxu1 %v397_v31 }
 0x2db   :  { %2002 = vmatprep.subr.mxu1 %v2248_v8 }
 0x2dc   :  { %v2158_v32 = vpop.eup %2157 }
 0x2dd   :  { %v310_v33 = vsel %vm144_vm2, %v2158_v32, 0.0  ;;  %v475_v36 = vpop.permute.xlu1 %474 }
 0x2de   :  { %311 = vadd.xlane.f32.xlu0 %v310_v33 }
 0x2e0   :  { %v2160_v34 = vpop.eup %2159 }
 0x2e1   :  { %v313_v35 = vsel %vm144_vm2, %v2160_v34, 0.0  ;;  %v553_v37 = vpop.permute.xlu1 %552 }
 0x2e2   :  { %314 = vadd.xlane.f32.xlu1 %v313_v35 }
 0x2f3   :  { %550 = vrot.lane.b32.xlu1 %v2370_v17, %s2253_s29 }
 0x2f4   :  { %472 = vrot.lane.b32.xlu0 %v2362_v15, %s2253_s29 }
 0x36b   :  { %v312_v38 = vpop.xlane.xlu0 %311 }
 0x36c   :  { %2161 = vrcp.f32 %v312_v38 }
 0x36f   :  { %v315_v39 = vpop.xlane.xlu1 %314  ;;  %v473_v44 = vpop.permute.xlu0 %472 }
 0x370   :  { %2163 = vrcp.f32 %v315_v39 }
 0x373   :  { %v551_v45 = vpop.permute.xlu1 %550 }
 0x376   :  { %v2162_v40 = vpop.eup %2161 }
 0x377   :  { %v318_v41 = vmul.f32 %v2162_v40, %v2158_v32 }
 0x379   :  { %1990 = vmatmul.mubr.msk.f32.vlgmr.msra.gmra.mrb[0].mxu0 %vm144_vm2, %v318_v41 }
 0x37a   :  { %v2164_v42 = vpop.eup %2163  ;;  %1998 = vmatpush3.xpose.msk.msra.mxu0 %vm144_vm2, %v475_v36  ;;  %1999 = vmatprep.mubr.msk.f32.mxu0 %vm2249_vm1, %v2248_v8 }
 0x37b   :  { %v319_v43 = vmul.f32 %v2164_v42, %v2160_v34  ;;  %2007 = vmatprep.subr.mxu0 %v2248_v8 }
 0x37d   :  { %1995 = vmatmul.mubr.msk.f32.vlgmr.msra.gmra.mrb[6].mxu1 %vm144_vm2, %v319_v43  ;;  %2000 = vmatmul.mubr.msk.f32.vlgmr.msra.gmra.mrb[2].mxu0 %vm144_vm2, %v473_v44 }
 0x37e   :  { %2003 = vmatpush3.xpose.msk.msra.mxu1 %vm144_vm2, %v553_v37  ;;  %2004 = vmatprep.mubr.msk.f32.mxu1 %vm2249_vm1, %v2248_v8 }
 0x37f   :  { %2012 = vmatprep.subr.mxu1 %v2248_v8  ;;  %2009 = vmatprep.mubr.msk.f32.mxu0 %vm2249_vm1, %v2248_v8 }
 0x381   :  { %2005 = vmatmul.mubr.msk.f32.vlgmr.msra.gmra.mrb[8].mxu1 %vm144_vm2, %v551_v45 }
 0x382   :  { %2014 = vmatprep.mubr.msk.f32.mxu1 %vm2249_vm1, %v2248_v8 }
 0x44c   :  { %v2405_v46 = vpop.f32.mrb[0].mxu0 }
 0x44d   :  { %v1991_v47 = vpop.f32.mrb[1].mxu0 }
 0x450   :  { %v2407_v48 = vpop.f32.mrb[6].mxu1  ;;  %v546_v49 = vpop.f32.mrb[2].mxu0 }
 0x451   :  { %v1996_v50 = vpop.f32.mrb[7].mxu1  ;;  %v2001_v51 = vpop.f32.mrb[3].mxu0  ;;  %v628_v52 = vsel %vm144_vm2, %v546_v49, -inf }
 0x452   :  { %629 = vmax.xlane.f32.xlu1 %v628_v52 }
 0x454   :  { %v624_v53 = vpop.f32.mrb[8].mxu1 }
 0x455   :  { %v2006_v54 = vpop.f32.mrb[9].mxu1  ;;  %v631_v55 = vsel %vm144_vm2, %v624_v53, -inf }
 0x456   :  { %632 = vmax.xlane.f32.xlu0 %v631_v55 }
 0x463   :  { %650 = vrot.lane.b32.xlu1 %v2353_v12, %s2254_s30 }
 0x467   :  { %804 = vrot.lane.b32.xlu1 %v2353_v12, %s2255_s9 }
 0x46b   :  { %882 = vrot.lane.b32.xlu1 %v2356_v13, %s2255_s9 }
 0x46c   :  { %726 = vrot.lane.b32.xlu0 %v2356_v13, %s2254_s30 }
 0x470   :  { %802 = vrot.lane.b32.xlu0 %v2362_v15, %s2256_s10 }
 0x4df   :  { %v630_v56 = vpop.xlane.xlu1 %629 }
 0x4e0   :  { %v634_v57 = vsub.f32 %v546_v49, %v630_v56 }
 0x4e2   :  { %v636_v58 = vmul.f32 1.442695, %v634_v57 }
 0x4e3   :  { %v651_v59 = vpop.permute.xlu1 %650  ;;  %v633_v60 = vpop.xlane.xlu0 %632 }
 0x4e4   :  { %2165 = vpow2.f32 %v636_v58  ;;  %v635_v61 = vsub.f32 %v624_v53, %v633_v60  ;;  %2008 = vmatpush3.msra.mxu0 %v651_v59 }
 0x4e5   :  { %2017 = vmatprep.subr.mxu0 %v2248_v8 }
 0x4e6   :  { %v638_v62 = vmul.f32 1.442695, %v635_v61 }
 0x4e7   :  { %v727_v63 = vpop.permute.xlu0 %726  ;;  %v805_v4 = vpop.permute.xlu1 %804 }
 0x4e8   :  { %2167 = vpow2.f32 %v638_v62  ;;  %2013 = vmatpush3.msra.mxu1 %v727_v63 }
 0x4e9   :  { %2022 = vmatprep.subr.mxu1 %v2248_v8 }
 0x4eb   :  { %v883_v6 = vpop.permute.xlu1 %882  ;;  %v803_v19 = vpop.permute.xlu0 %802 }
 0x4ee   :  { %v2166_v0 = vpop.eup %2165 }
 0x4ef   :  { %v640_v1 = vsel %vm144_vm2, %v2166_v0, 0.0 }
 0x4f0   :  { %641 = vadd.xlane.f32.xlu1 %v640_v1 }
 0x4f2   :  { %v2168_v2 = vpop.eup %2167 }
 0x4f3   :  { %v643_v3 = vsel %vm144_vm2, %v2168_v2, 0.0 }
 0x4f4   :  { %644 = vadd.xlane.f32.xlu1 %v643_v3 }
 0x505   :  { %880 = vrot.lane.b32.xlu1 %v2370_v17, %s2256_s10 }
 0x57d   :  { %v642_v9 = vpop.xlane.xlu1 %641 }
 0x57e   :  { %2169 = vrcp.f32 %v642_v9 }
 0x581   :  { %v645_v10 = vpop.xlane.xlu1 %644 }
 0x582   :  { %2171 = vrcp.f32 %v645_v10 }
 0x585   :  { %v881_v20 = vpop.permute.xlu1 %880 }
 0x588   :  { %v2170_v11 = vpop.eup %2169 }
 0x589   :  { %v648_v14 = vmul.f32 %v2170_v11, %v2166_v0 }
 0x58b   :  { %2010 = vmatmul.mubr.msk.f32.vlgmr.msra.gmra.mrb[4].mxu0 %vm144_vm2, %v648_v14 }
 0x58c   :  { %v2172_v16 = vpop.eup %2171  ;;  %2018 = vmatpush3.xpose.msk.msra.mxu0 %vm144_vm2, %v805_v4  ;;  %2019 = vmatprep.mubr.msk.f32.mxu0 %vm2249_vm1, %v2248_v8 }
 0x58d   :  { %v649_v18 = vmul.f32 %v2172_v16, %v2168_v2  ;;  %2027 = vmatprep.subr.mxu0 %v2248_v8 }
 0x58f   :  { %2015 = vmatmul.mubr.msk.f32.vlgmr.msra.gmra.mrb[10].mxu1 %vm144_vm2, %v649_v18  ;;  %2020 = vmatmul.mubr.msk.f32.vlgmr.msra.gmra.mrb[6].mxu0 %vm144_vm2, %v803_v19 }
 0x590   :  { %2023 = vmatpush3.xpose.msk.msra.mxu1 %vm144_vm2, %v883_v6  ;;  %2024 = vmatprep.mubr.msk.f32.mxu1 %vm2249_vm1, %v2248_v8 }
 0x591   :  { %2032 = vmatprep.subr.mxu1 %v2248_v8  ;;  %2029 = vmatprep.mubr.msk.f32.mxu0 %vm2249_vm1, %v2248_v8 }
 0x593   :  { %2025 = vmatmul.mubr.msk.f32.vlgmr.msra.gmra.mrb[12].mxu1 %vm144_vm2, %v881_v20 }
 0x594   :  { %2034 = vmatprep.mubr.msk.f32.mxu1 %vm2249_vm1, %v2248_v8 }
 0x65e   :  { %v2437_v21 = vpop.f32.mrb[4].mxu0 }
 0x65f   :  { %v2011_v22 = vpop.f32.mrb[5].mxu0 }
 0x660   :  { %v1495_v22 = vld [vmem:[%s2589_s3] sm:$0xff] }
 0x662   :  { %v2439_v23 = vpop.f32.mrb[10].mxu1  ;;  %v876_v24 = vpop.f32.mrb[6].mxu0 }
 0x663   :  { %v2016_v25 = vpop.f32.mrb[11].mxu1  ;;  %v2021_v26 = vpop.f32.mrb[7].mxu0  ;;  %v958_v27 = vsel %vm144_vm2, %v876_v24, -inf }
 0x664   :  { %959 = vmax.xlane.f32.xlu0 %v958_v27  ;;  %v1498_v25 = vld [vmem:[%s2589_s3 + $0x18] sm:$0xff] }
 0x666   :  { %v954_v28 = vpop.f32.mrb[12].mxu1 }
 0x667   :  { %v2026_v29 = vpop.f32.mrb[13].mxu1  ;;  %v961_v30 = vsel %vm144_vm2, %v954_v28, -inf }
 0x668   :  { %962 = vmax.xlane.f32.xlu1 %v961_v30 }
 0x679   :  { %980 = vrot.lane.b32.xlu1 %v2353_v12, %s2257_s11 }
 0x67a   :  { %1056 = vrot.lane.b32.xlu0 %v2356_v13, %s2257_s11 }
 0x67d   :  { %1134 = vrot.lane.b32.xlu1 %v2353_v12, %s2258_s12 }
 0x681   :  { %1212 = vrot.lane.b32.xlu1 %v2356_v13, %s2258_s12 }
 0x685   :  { %1210 = vrot.lane.b32.xlu1 %v2370_v17, %s2259_s13 }
 0x6f1   :  { %v960_v31 = vpop.xlane.xlu0 %959 }
 0x6f2   :  { %v964_v32 = vsub.f32 %v876_v24, %v960_v31  ;;  %v1497_v24 = vld [vmem:[%s2589_s3 + $0x10] sm:$0xff] }
 0x6f3   :  { %v2110_v26 = vpack.c.bf16 %v1498_v25, %v1497_v24 }
 0x6f4   :  { %v966_v33 = vmul.f32 1.442695, %v964_v32 }
 0x6f5   :  { %v1057_v34 = vpop.permute.xlu0 %1056  ;;  %v963_v35 = vpop.xlane.xlu1 %962 }
 0x6f6   :  { %2173 = vpow2.f32 %v966_v33  ;;  %v965_v36 = vsub.f32 %v954_v28, %v963_v35  ;;  %2033 = vmatpush3.msra.mxu1 %v1057_v34 }
 0x6f7   :  { %2042 = vmatprep.subr.mxu1 %v2248_v8 }
 0x6f8   :  { %v968_v37 = vmul.f32 1.442695, %v965_v36 }
 0x6f9   :  { %v981_v38 = vpop.permute.xlu1 %980 }
 0x6fa   :  { %2175 = vpow2.f32 %v968_v37  ;;  %2028 = vmatpush3.msra.mxu0 %v981_v38 }
 0x6fb   :  { %2037 = vmatprep.subr.mxu0 %v2248_v8 }
 0x6fd   :  { %v1135_v44 = vpop.permute.xlu1 %1134 }
 0x700   :  { %v2174_v39 = vpop.eup %2173 }
 0x701   :  { %v970_v40 = vsel %vm144_vm2, %v2174_v39, 0.0  ;;  %v1213_v50 = vpop.permute.xlu1 %1212 }
 0x702   :  { %971 = vadd.xlane.f32.xlu0 %v970_v40 }
 0x704   :  { %v2176_v17 = vpop.eup %2175 }
 0x705   :  { %v973_v41 = vsel %vm144_vm2, %v2176_v17, 0.0  ;;  %v1211_v52 = vpop.permute.xlu1 %1210 }
 0x706   :  { %974 = vadd.xlane.f32.xlu0 %v973_v41 }
 0x71c   :  { %1132 = vrot.lane.b32.xlu0 %v2362_v15, %s2259_s13 }
 0x78f   :  { %v972_v42 = vpop.xlane.xlu0 %971 }
 0x790   :  { %2177 = vrcp.f32 %v972_v42  ;;  %v1499_v42 = vlaneseq }
 0x793   :  { %v975_v43 = vpop.xlane.xlu0 %974 }
 0x794   :  { %2179 = vrcp.f32 %v975_v43  ;;  %v2499_v43 = vshrl.u32 %v1499_v42, 7 }
 0x796   :  { %v1621_v24 = vsub.s32 2, %v2499_v43 }
 0x797   :  { %v1133_v15 = vpop.permute.xlu0 %1132 }
 0x79a   :  { %v2178_v45 = vpop.eup %2177 }
 0x79b   :  { %v978_v47 = vmul.f32 %v2178_v45, %v2174_v39 }
 0x79d   :  { %2030 = vmatmul.mubr.msk.f32.vlgmr.msra.gmra.mrb[8].mxu0 %vm144_vm2, %v978_v47 }
 0x79e   :  { %v2180_v49 = vpop.eup %2179  ;;  %2038 = vmatpush3.xpose.msk.msra.mxu0 %vm144_vm2, %v1135_v44  ;;  %2039 = vmatprep.mubr.msk.f32.mxu0 %vm2249_vm1, %v2248_v8  ;;  %v2505_v44 = vld [vmem:[%s2592_s6] sm:$0x3f] }
 0x79f   :  { %v979_v51 = vmul.f32 %v2180_v49, %v2176_v17  ;;  %2047 = vmatprep.subr.mxu0 %v2248_v8 }
 0x7a1   :  { %2035 = vmatmul.mubr.msk.f32.vlgmr.msra.gmra.mrb[14].mxu1 %vm144_vm2, %v979_v51  ;;  %2040 = vmatmul.mubr.msk.f32.vlgmr.msra.gmra.mrb[10].mxu0 %vm144_vm2, %v1133_v15 }
 0x7a2   :  { %2043 = vmatpush3.xpose.msk.msra.mxu1 %vm144_vm2, %v1213_v50  ;;  %2044 = vmatprep.mubr.msk.f32.mxu1 %vm2249_vm1, %v2248_v8 }
 0x7a3   :  { %2052 = vmatprep.subr.mxu1 %v2248_v8  ;;  %2049 = vmatprep.mubr.msk.f32.mxu0 %vm2249_vm1, %v2248_v8 }
 0x7a5   :  { %2045 = vmatmul.mubr.msk.f32.vlgmr.msra.gmra.mrb[16].mxu1 %vm144_vm2, %v1211_v52 }
 0x7a6   :  { %2054 = vmatprep.mubr.msk.f32.mxu1 %vm2249_vm1, %v2248_v8 }
 0x870   :  { %v1052_v53 = vpop.f32.mrb[8].mxu0 }
 0x871   :  { %v2031_v54 = vpop.f32.mrb[9].mxu0 }
 0x874   :  { %v1128_v55 = vpop.f32.mrb[14].mxu1  ;;  %v1206_v56 = vpop.f32.mrb[10].mxu0 }
 0x875   :  { %v2036_v57 = vpop.f32.mrb[15].mxu1  ;;  %v2041_v58 = vpop.f32.mrb[11].mxu0  ;;  %v1288_v59 = vsel %vm144_vm2, %v1206_v56, -inf }
 0x876   :  { %1289 = vmax.xlane.f32.xlu0 %v1288_v59 }
 0x878   :  { %v1284_v60 = vpop.f32.mrb[16].mxu1 }
 0x879   :  { %v2046_v61 = vpop.f32.mrb[17].mxu1  ;;  %v1291_v62 = vsel %vm144_vm2, %v1284_v60, -inf }
 0x87a   :  { %1292 = vmax.xlane.f32.xlu1 %v1291_v62 }
 0x88b   :  { %1310 = vrot.lane.b32.xlu1 %v2353_v12, %s2260_s14 }
 0x88f   :  { %1464 = vrot.lane.b32.xlu1 %v2437_v21, %s2247_s16 }
 0x893   :  { %1466 = vrot.lane.b32.xlu1 %v2439_v23, %s2247_s16 }
 0x897   :  { %1474 = vrot.lane.b32.xlu1 %v1128_v55, %s2261_s17 }
 0x903   :  { %v1290_v8 = vpop.xlane.xlu0 %1289 }
 0x904   :  { %v1294_v63 = vsub.f32 %v1206_v56, %v1290_v8  ;;  %v1626_v8 = vld [vmem:[%s2590_s4 + $0x8] sm:$0xff] }
 0x906   :  { %v1296_v0 = vmul.f32 1.442695, %v1294_v63 }
 0x907   :  { %v1293_v1 = vpop.xlane.xlu1 %1292 }
 0x908   :  { %2181 = vpow2.f32 %v1296_v0  ;;  %v1295_v2 = vsub.f32 %v1284_v60, %v1293_v1  ;;  %v1627_v0 = vld [vmem:[%s2590_s4 + $0x10] sm:$0xff]  ;;  %v1628_v1 = vld [vmem:[%s2590_s4 + $0x18] sm:$0xff] }
 0x90a   :  { %v1298_v3 = vmul.f32 1.442695, %v1295_v2  ;;  %v2118_v2 = vpack.c.bf16 %v1628_v1, %v1627_v0 }
 0x90b   :  { %v1311_v4 = vpop.permute.xlu1 %1310 }
 0x90c   :  { %2183 = vpow2.f32 %v1298_v3  ;;  %2048 = vmatpush3.msra.mxu0 %v1311_v4  ;;  %v1719_v3 = vld [vmem:[%s2591_s5] sm:$0xff]  ;;  %v1720_v4 = vld [vmem:[%s2591_s5 + $0x8] sm:$0xff] }
 0x90f   :  { %v1465_v31 = vpop.permute.xlu1 %1464 }
 0x910   :  { %v1486_v34 = vsel %vm144_vm2, %v2405_v46, %v1465_v31  ;;  %v1501_v46 = vsub.s32 0, %v2499_v43 }
 0x912   :  { %v2182_v6 = vpop.eup %2181  ;;  %v1502_v45 = vrot.slane %v2505_v44, %v1501_v46 }
 0x913   :  { %v1300_v12 = vsel %vm144_vm2, %v2182_v6, 0.0  ;;  %v1467_v32 = vpop.permute.xlu1 %1466 }
 0x914   :  { %1301 = vadd.xlane.f32.xlu0 %v1300_v12  ;;  %v1487_v39 = vsel %vm144_vm2, %v2407_v48, %v1467_v32  ;;  %v2122_v12 = vpack.c.bf16 %v1720_v4, %v1719_v3  ;;  %v1843_v4 = vsub.s32 3, %v2499_v43 }
 0x916   :  { %v2184_v9 = vpop.eup %2183 }
 0x917   :  { %v1303_v10 = vsel %vm144_vm2, %v2184_v9, 0.0  ;;  %v1475_v35 = vpop.permute.xlu1 %1474 }
 0x918   :  { %1304 = vadd.xlane.f32.xlu0 %v1303_v10  ;;  %v1490_v40 = vsel %vm1488_vm4, %v1487_v39, %v1475_v35  ;;  %v1725_v35 = vld [vmem:[%s2591_s5 + $0x30] sm:$0xff] }
 0x92e   :  { %1386 = vrot.lane.b32.xlu0 %v2356_v13, %s2260_s14  ;;  %v1496_v13 = vld [vmem:[%s2589_s3 + $0x8] sm:$0xff] }
 0x92f   :  { %v2106_v23 = vpack.c.bf16 %v1496_v13, %v1495_v22 }
 0x931   :  { %2107 = vmatprep.subr.bf16.mxu0 %v2106_v23 }
 0x932   :  { %1472 = vrot.lane.b32.xlu0 %v1052_v53, %s2261_s17 }
 0x9a1   :  { %v1302_v11 = vpop.xlane.xlu0 %1301 }
 0x9a2   :  { %2185 = vrcp.f32 %v1302_v11  ;;  %v1723_v11 = vld [vmem:[%s2591_s5 + $0x20] sm:$0xff] }
 0x9a5   :  { %v1305_v14 = vpop.xlane.xlu0 %1304 }
 0x9a6   :  { %2187 = vrcp.f32 %v1305_v14  ;;  %v1724_v14 = vld [vmem:[%s2591_s5 + $0x28] sm:$0xff] }
 0x9a9   :  { %v1387_v16 = vpop.permute.xlu0 %1386 }
 0x9aa   :  { %2053 = vmatpush3.msra.mxu1 %v1387_v16  ;;  %v2130_v16 = vpack.c.bf16 %v1724_v14, %v1723_v11 }
 0x9ac   :  { %v2186_v18 = vpop.eup %2185 }
 0x9ad   :  { %v1308_v19 = vmul.f32 %v2186_v18, %v2182_v6  ;;  %v1473_v33 = vpop.permute.xlu0 %1472  ;;  %v1721_v6 = vld [vmem:[%s2591_s5 + $0x10] sm:$0xff] }
 0x9ae   :  { %v1489_v36 = vsel %vm1488_vm4, %v1486_v34, %v1473_v33 }
 0x9af   :  { %2050 = vmatmul.mubr.msk.f32.vlgmr.msra.gmra.mrb[12].mxu0 %vm144_vm2, %v1308_v19 }
 0x9b0   :  { %v2188_v20 = vpop.eup %2187  ;;  %2109 = vmatpush3.bf16.msra.mxu0 %v2106_v23  ;;  %v1615_v23 = vsub.s32 1, %v2499_v43 }
 0x9b1   :  { %v1309_v21 = vmul.f32 %v2188_v20, %v2184_v9  ;;  %2111 = vmatprep.subr.bf16.mxu0 %v2110_v26  ;;  %v1722_v9 = vld [vmem:[%s2591_s5 + $0x18] sm:$0xff] }
 0x9b2   :  { %v2126_v10 = vpack.c.bf16 %v1722_v9, %v1721_v6  ;;  %v1616_v25 = vrot.slane %v2505_v44, %v1615_v23  ;;  %v1849_v6 = vsub.s32 4, %v2499_v43 }
 0x9b3   :  { %2055 = vmatmul.mubr.msk.f32.vlgmr.msra.gmra.mrb[18].mxu1 %vm144_vm2, %v1309_v21 }
 0x9b4   :  { %2113 = vmatpush3.bf16.msra.mxu0 %v2110_v26  ;;  %v1850_v14 = vrot.slane %v2505_v44, %v1849_v6 }
 0x9b5   :  { %2123 = vmatprep.subr.bf16.mxu0 %v2122_v12 }
 0xa82   :  { %v1382_v27 = vpop.f32.mrb[12].mxu0 }
 0xa83   :  { %1480 = vrot.lane.b32.xlu0 %v1382_v27, %s2262_s26  ;;  %v2051_v28 = vpop.f32.mrb[13].mxu0 }
 0xa84   :  { %v1622_v28 = vrot.slane %v2505_v44, %v1621_v24 }
 0xa86   :  { %v1458_v29 = vpop.f32.mrb[18].mxu1 }
 0xa87   :  { %1482 = vrot.lane.b32.xlu1 %v1458_v29, %s2262_s26  ;;  %v2056_v30 = vpop.f32.mrb[19].mxu1 }
 0xaf5   :  { %v1481_v37 = vpop.permute.xlu0 %1480 }
 0xaf6   :  { %v1492_v38 = vsel %vm1491_vm3, %v1489_v36, %v1481_v37  ;;  %v1726_v36 = vld [vmem:[%s2591_s5 + $0x38] sm:$0xff]  ;;  %s2263_s5 = smov [#allocation5]  }
 0xaf7   :  { %2065 = vmatprep.mubr.msk.f32.mxu0 %vm57_vm0, %v1492_v38  ;;  %v2134_v37 = vpack.c.bf16 %v1726_v36, %v1725_v35  ;;  %v1901_v38 = vld [vmem:[%s2593_s7] ss:$0 sm:$0xff]  ;;  %s1860_s7 = sshll.u32 %s2263_s5, 4  ;;  %s1861_s7 = int_to_ptr.vmem [resolvable:$true] %s1860_s7 }
 0xaf8   :  { %s2219_s6 = scalar_lea.vmem %s1861_s7, 256  ;;  %p2224_p9 = scmp.lt.s32.totalorder %s1861_s7, %s1861_s7 }
 0xaf9   :  { %v1483_v17 = vpop.permute.xlu1 %1482  ;;  %p2220_p8 = scmp.ne.s32.totalorder %s1861_s7, %s2219_s6  ;;  %p2225_p10 = scmp.lt.s32.totalorder %s2219_s6, %s2219_s6 }
 0xafa   :  { %v1493_v41 = vsel %vm1491_vm3, %v1490_v40, %v1483_v17 }
 0xafb   :  { %2066 = vmatmul.mubr.msk.f32.vlgmr.msra.gmra.mrb[14].mxu0 %vm57_vm0, %v1493_v41  ;;  %p2226_p11 = por %p2225_p10, %p2224_p9 }
 0xafc   :  { %2125 = vmatpush3.bf16.msra.mxu0 %v2122_v12  ;;  %v1844_v12 = vrot.slane %v2505_v44, %v1843_v4 }
 0xafd   :  { %2127 = vmatprep.subr.bf16.mxu0 %v2126_v10  ;;  %p2227_p12 = pnand %p2226_p11, %p2220_p8 }
 0xb00   :  { %2129 = vmatpush3.bf16.msra.mxu0 %v2126_v10 }
 0xb01   :  { %2131 = vmatprep.subr.bf16.mxu0 %v2130_v16 }
 0xb04   :  { %2133 = vmatpush3.bf16.msra.mxu0 %v2130_v16 }
 0xb05   :  { %2135 = vmatprep.subr.bf16.mxu0 %v2134_v37 }
 0xb08   :  { %2137 = vmatpush3.bf16.msra.mxu0 %v2134_v37 }
 0xbce   :  { %v2067_v47 = vpop.f32.mrb[14].mxu0 }
 0xbcf   :  { %v1581_v49 = vadd.f32 %v2067_v47, %v1502_v45  ;;  %v1575_v48 = vpop.f32.mrb[15].mxu0 }
 0xbd0   :  { %v1576_v50 = vadd.f32 %v1575_v48, %v1502_v45  ;;  %v1729_v45 = vsub.s32 5, %v2499_v43 }
 0xbd1   :  { %v1585_v51 = vadd.f32 %v1581_v49, %v2340_v7 }
 0xbd2   :  { %v1584_v15 = vadd.f32 %v1576_v50, %v2336_v5  ;;  %v1625_v5 = vld [vmem:[%s2590_s4] sm:$0xff]  ;;  %v1730_v47 = vrot.slane %v2505_v44, %v1729_v45 }
 0xbd3   :  { %v1589_v52 = vsel %vm57_vm0, %v1585_v51, 0.0  ;;  %v2114_v63 = vpack.c.bf16 %v1626_v8, %v1625_v5 }
 0xbd4   :  { %1590 = vadd.xlane.f32.xlu1 %v1589_v52  ;;  %v1586_v53 = vsel %vm57_vm0, %v1584_v15, 0.0 }
 0xbd5   :  { %1587 = vadd.xlane.f32.xlu0 %v1586_v53  ;;  %2115 = vmatprep.subr.bf16.mxu1 %v2114_v63 }
 0xbd6   :  { %2117 = vmatpush3.bf16.msra.mxu1 %v2114_v63 }
 0xbd7   :  { %2119 = vmatprep.subr.bf16.mxu1 %v2118_v2 }
 0xbda   :  { %2121 = vmatpush3.bf16.msra.mxu1 %v2118_v2 }
 0xc61   :  { %v1591_v54 = vpop.xlane.xlu1 %1590 }
 0xc62   :  { %v1594_v55 = vmul.f32 0.03125, %v1591_v54  ;;  %v1588_v56 = vpop.xlane.xlu0 %1587 }
 0xc63   :  { %v1593_v57 = vmul.f32 0.03125, %v1588_v56 }
 0xc64   :  { %v1596_v58 = vsub.f32 %v1585_v51, %v1594_v55 }
 0xc65   :  { %v1595_v59 = vsub.f32 %v1584_v15, %v1593_v57 }
 0xc66   :  { %v1598_v62 = vmul.f32 %v1596_v58, %v1596_v58 }
 0xc67   :  { %v1597_v60 = vmul.f32 %v1595_v59, %v1595_v59 }
 0xc68   :  { %v1602_v7 = vsel %vm57_vm0, %v1598_v62, 0.0 }
 0xc69   :  { %v1599_v61 = vsel %vm57_vm0, %v1597_v60, 0.0 }
 0xc6a   :  { %1600 = vadd.xlane.f32.xlu0 %v1599_v61 }
 0xc6e   :  { %1603 = vadd.xlane.f32.xlu0 %v1602_v7 }
 0xcf7   :  { %v1601_v18 = vpop.xlane.xlu0 %1600 }
 0xcf8   :  { %v1605_v19 = vmul.f32 0.03125, %v1601_v18 }
 0xcfa   :  { %v1607_v20 = vadd.f32 1e-05, %v1605_v19 }
 0xcfb   :  { %v1604_v21 = vpop.xlane.xlu0 %1603 }
 0xcfc   :  { %2189 = vrsqrt.f32 %v1607_v20  ;;  %v1606_v22 = vmul.f32 0.03125, %v1604_v21 }
 0xcfe   :  { %v1608_v13 = vadd.f32 1e-05, %v1606_v22 }
 0xd00   :  { %2191 = vrsqrt.f32 %v1608_v13 }
 0xd06   :  { %v2190_v26 = vpop.eup %2189 }
 0xd07   :  { %v1611_v27 = vmul.f32 %v2190_v26, %v1595_v59 }
 0xd09   :  { %v1617_v29 = vmul.f32 %v1616_v25, %v1611_v27 }
 0xd0a   :  { %v2192_v30 = vpop.eup %2191 }
 0xd0b   :  { %v1612_v31 = vmul.f32 %v2192_v30, %v1596_v58  ;;  %v1623_v32 = vadd.f32 %v1622_v28, %v1617_v29 }
 0xd0d   :  { %v1618_v33 = vmul.f32 %v1616_v25, %v1612_v31  ;;  %2076 = vmatprep.mubr.msk.f32.mxu1 %vm57_vm0, %v1623_v32 }
 0xd0f   :  { %v1624_v34 = vadd.f32 %v1622_v28, %v1618_v33 }
 0xd11   :  { %2077 = vmatmul.mubr.msk.f32.vlgmr.msra.gmra.mrb[20].mxu1 %vm57_vm0, %v1624_v34 }
 0xde4   :  { %v2078_v39 = vpop.f32.mrb[20].mxu1 }
 0xde5   :  { %v1714_v40 = vadd.f32 %v2078_v39, %v1901_v38  ;;  %v1708_v17 = vpop.f32.mrb[21].mxu1 }
 0xde6   :  { %v1709_v41 = vadd.f32 %v1901_v38, %v1708_v17 }
 0xde7   :  { %v1718_v46 = vmax.f32 %v1714_v40, 0.0 }
 0xde8   :  { %v1717_v42 = vmax.f32 %v1709_v41, 0.0 }
 0xdea   :  { %2095 = vmatprep.mubr.msk.f32.mxu0 %vm1731_vm5, %v1717_v42 }
 0xdeb   :  { %2096 = vmatmul.mubr.msk.f32.vlgmr.msra.gmra.mrb[16].mxu0 %vm1731_vm5, %v1718_v46 }
 0xebe   :  { %v2097_v49 = vpop.f32.mrb[16].mxu0 }
 0xebf   :  { %v1810_v48 = vadd.f32 %v2097_v49, %v1730_v47  ;;  %v1804_v50 = vpop.f32.mrb[17].mxu0 }
 0xec0   :  { %v1805_v51 = vadd.f32 %v1804_v50, %v1730_v47 }
 0xec1   :  { %v1814_v15 = vadd.f32 %v1810_v48, %v1624_v34 }
 0xec2   :  { %v1813_v52 = vadd.f32 %v1805_v51, %v1623_v32 }
 0xec3   :  { %v1818_v53 = vsel %vm57_vm0, %v1814_v15, 0.0 }
 0xec4   :  { %1819 = vadd.xlane.f32.xlu0 %v1818_v53  ;;  %v1815_v54 = vsel %vm57_vm0, %v1813_v52, 0.0 }
 0xec5   :  { %1816 = vadd.xlane.f32.xlu1 %v1815_v54 }
 0xf51   :  { %v1820_v55 = vpop.xlane.xlu0 %1819 }
 0xf52   :  { %v1822_v56 = vmul.f32 0.03125, %v1820_v55  ;;  %v1817_v57 = vpop.xlane.xlu1 %1816 }
 0xf53   :  { %v1821_v58 = vmul.f32 0.03125, %v1817_v57 }
 0xf54   :  { %v1824_v59 = vsub.f32 %v1814_v15, %v1822_v56 }
 0xf55   :  { %v1823_v60 = vsub.f32 %v1813_v52, %v1821_v58 }
 0xf56   :  { %v1826_v61 = vmul.f32 %v1824_v59, %v1824_v59 }
 0xf57   :  { %v1825_v62 = vmul.f32 %v1823_v60, %v1823_v60 }
 0xf58   :  { %v1830_v7 = vsel %vm57_vm0, %v1826_v61, 0.0 }
 0xf59   :  { %1831 = vadd.xlane.f32.xlu0 %v1830_v7  ;;  %v1827_v5 = vsel %vm57_vm0, %v1825_v62, 0.0 }
 0xf5a   :  { %1828 = vadd.xlane.f32.xlu1 %v1827_v5 }
 0xfe6   :  { %v1832_v8 = vpop.xlane.xlu0 %1831 }
 0xfe7   :  { %v1834_v63 = vmul.f32 0.03125, %v1832_v8  ;;  %v1829_v0 = vpop.xlane.xlu1 %1828 }
 0xfe8   :  { %v1833_v1 = vmul.f32 0.03125, %v1829_v0 }
 0xfe9   :  { %v1836_v2 = vadd.f32 1e-05, %v1834_v63 }
 0xfea   :  { %v1835_v3 = vadd.f32 1e-05, %v1833_v1 }
 0xfeb   :  { %2193 = vrsqrt.f32 %v1836_v2 }
 0xfec   :  { %2195 = vrsqrt.f32 %v1835_v3 }
 0xff5   :  { %v2194_v9 = vpop.eup %2193 }
 0xff6   :  { %v2196_v10 = vpop.eup %2195  ;;  %v1840_v11 = vmul.f32 %v2194_v9, %v1824_v59 }
 0xff7   :  { %v1839_v16 = vmul.f32 %v2196_v10, %v1823_v60 }
 0xff8   :  { %v1846_v18 = vmul.f32 %v1844_v12, %v1840_v11 }
 0xff9   :  { %v1845_v19 = vmul.f32 %v1844_v12, %v1839_v16 }
 0xffa   :  { %v1852_v20 = vadd.f32 %v1850_v14, %v1846_v18 }
 0xffb   :  { %v1851_v21 = vadd.f32 %v1850_v14, %v1845_v19 }
 0xffc   :  { %1854 = vst.msk [vmem:[#allocation5 + $0x8] sm:$0xff] %vm57_vm0, %v1852_v20 }
 0xffd   :  { %1853 = vst.msk [vmem:[#allocation5] sm:$0xff] %vm57_vm0, %v1851_v21 }
 0xffe   :  { %2230 = shalt.err (!%p2227_p12)
}
 0xfff   :  { %s2231_s2 = scalar_lea.hbm %s2594_s8, 256 }
0x1000   :  { %p2232_p13 = scmp.ne.s32.totalorder %s2594_s8, %s2231_s2  ;;  %p2235_p0 = scmp.lt.u32.totalorder %s2231_s2, %s2594_s8 }
0x1002   :  { %p2237_p1 = pnand %p2235_p0, %p2232_p13 }
0x1004   :  { %2240 = shalt.err (!%p2237_p1)
}
0x1005   :  { %1866 = dma.vmem_to_hbm [thread:$0]  %s1861_s7, 256, %s2594_s8, [#allocation4], %s2246_s15, %s2246_s15, %s2247_s16  }
0x1006   :  { %2243 = dma.done.wait [#allocation4], 256  }
0x1007   :  { %2244 = vsyncadd [#allocation4], 4294967040 }
0x1008   :  { %1870 = vsyncpa [#allocation3], 1 }
0x1009   :  { %1871 = vsyncpa [#allocation4], 1 }

</bundles_post_ra>
